<compile_context>
chip_gen: v7x
topology: tpu7x:2x2x1
jax: 0.10.0
libtpu: 0.0.40
codegen_flags: <defaults>
</compile_context>

<pallas_src>
import jax
import jax.numpy as jnp
from jax import lax
from jax.experimental import pallas as pl
from jax.experimental.pallas import tpu as pltpu


def _lstm_kernel(tok_ref, p_ref, whh_ref, out_ref):
    """Full-sequence LSTM; input projection folded into the table `p_ref`.

    tok_ref : (T*B, 1)   int32 VMEM -- token ids, row index = t*B + b
    p_ref   : (VP, 4H)   f32   VMEM -- emb @ W_ih^T + b_ih + b_hh (i|f|g|o),
                                       g-columns pre-scaled by 2, rows padded
    whh_ref : (H, 4H)    f32   VMEM -- W_hh^T, g-columns pre-scaled by 2
    out_ref : (B, T*H)   f32   VMEM -- hidden states, lane-dense
    """
    B = out_ref.shape[0]
    H = whh_ref.shape[0]
    T = out_ref.shape[1] // H
    VP = p_ref.shape[0]

    whh = whh_ref[...]  # (H, 4H), resident across all steps

    # All (b, t) input projections in one MXU op (off the recurrent chain):
    # one-hot(token) @ P.  Rows of the one-hot sum to 1, so the folded bias in
    # P is carried through exactly.
    tok = tok_ref[...]                                                # (T*B, 1)
    onehot = (tok == lax.broadcasted_iota(jnp.int32, (T * B, VP), 1)
              ).astype(jnp.float32)                                   # (T*B, VP)
    x_proj = jnp.dot(onehot, p_ref[...],
                     preferred_element_type=jnp.float32)              # (T*B, 4H)

    h = jnp.zeros((B, H), jnp.float32)
    c = jnp.zeros((B, H), jnp.float32)
    hs = []

    # T is small & static -> fully unrolled; h/c stay register-resident.
    for t in range(T):
        gates = x_proj[t * B:(t + 1) * B, :] + jnp.dot(
            h, whh, preferred_element_type=jnp.float32)               # (B, 4H)

        # Single sigmoid pass over the whole gate block; the g-columns of
        # `gates` already hold 2*z_g, so tanh(z_g) = 2*sigmoid(2*z_g) - 1.
        sg = jax.nn.sigmoid(gates)
        i_g = sg[:, 0 * H:1 * H]
        f_g = sg[:, 1 * H:2 * H]
        g_g = 2.0 * sg[:, 2 * H:3 * H] - 1.0
        o_g = sg[:, 3 * H:4 * H]

        c = f_g * c + i_g * g_g
        h = o_g * jnp.tanh(c)
        hs.append(h)

    # One lane-dense store for the whole sequence.
    out_ref[...] = jnp.concatenate(hs, axis=-1)                       # (B, T*H)


@jax.jit
def program_encoder_forward(x, emb_table, w_ih, w_hh, b_ih, b_hh):
    """x: (B, T) integer token ids. Returns lstm_out: (B, T, H) float32."""
    B, T = x.shape
    VOCAB = emb_table.shape[0]
    H = w_hh.shape[1]
    G = 4 * H
    VP = ((VOCAB + 7) // 8) * 8  # pad vocab rows to a sublane multiple

    # Scale the g-gate (2H:3H) columns by 2 so the kernel can use the
    # tanh(z) = 2*sigmoid(2z) - 1 identity with a single sigmoid pass.
    gscale = jnp.ones((G,), jnp.float32).at[2 * H:3 * H].set(2.0)

    # Fold Embedding + W_ih + both biases into one (VOCAB, 4H) table.
    p = (emb_table.astype(jnp.float32) @ w_ih.T.astype(jnp.float32)
         + (b_ih + b_hh)[None, :].astype(jnp.float32)) * gscale       # (VOCAB, 4H)
    p_pad = jnp.zeros((VP, G), jnp.float32).at[:VOCAB, :].set(p)      # (VP, 4H)
    whh_t = w_hh.T.astype(jnp.float32) * gscale                       # (H, 4H)

    # Token ids laid out so step t occupies contiguous rows [t*B, (t+1)*B).
    tok = x.astype(jnp.int32).T.reshape(T * B, 1)

    out_flat = pl.pallas_call(
        _lstm_kernel,
        out_shape=jax.ShapeDtypeStruct((B, T * H), jnp.float32),
        in_specs=[
            pl.BlockSpec(memory_space=pltpu.MemorySpace.VMEM),   # tok
            pl.BlockSpec(memory_space=pltpu.MemorySpace.VMEM),   # p_pad
            pl.BlockSpec(memory_space=pltpu.MemorySpace.VMEM),   # whh_t
        ],
        out_specs=pl.BlockSpec(memory_space=pltpu.MemorySpace.VMEM),
    )(tok, p_pad, whh_t)

    return out_flat.reshape(B, T, H)


def _reference_forward(x, emb_table, w_ih, w_hh, b_ih, b_hh):
    """Pure-JAX reference replicating torch.nn.LSTM semantics."""
    H = w_hh.shape[1]
    embedded = emb_table[x]                      # (B, T, E)

    def step(carry, x_t):
        h, c = carry
        gates = x_t @ w_ih.T + b_ih + h @ w_hh.T + b_hh
        i = jax.nn.sigmoid(gates[:, 0 * H:1 * H])
        f = jax.nn.sigmoid(gates[:, 1 * H:2 * H])
        g = jnp.tanh(gates[:, 2 * H:3 * H])
        o = jax.nn.sigmoid(gates[:, 3 * H:4 * H])
        c = f * c + i * g
        h = o * jnp.tanh(c)
        return (h, c), h

    B = x.shape[0]
    h0 = jnp.zeros((B, H), jnp.float32)
    c0 = jnp.zeros((B, H), jnp.float32)
    _, hs = lax.scan(step, (h0, c0), jnp.transpose(embedded, (1, 0, 2)))
    return jnp.transpose(hs, (1, 0, 2))


if __name__ == "__main__":
    VOCAB, E, H = 10, 8, 32
    B, T = 2, 8

    key = jax.random.PRNGKey(0)
    k_x, k_emb, k_wih, k_whh, k_bih, k_bhh = jax.random.split(key, 6)

    # Deterministic synthetic parameters (shapes match the PyTorch module).
    x = jax.random.randint(k_x, (B, T), 0, VOCAB, dtype=jnp.int32)
    emb_table = jax.random.normal(k_emb, (VOCAB, E), jnp.float32) * 0.5
    w_ih = jax.random.normal(k_wih, (4 * H, E), jnp.float32) * 0.1
    w_hh = jax.random.normal(k_whh, (4 * H, H), jnp.float32) * 0.1
    b_ih = jax.random.normal(k_bih, (4 * H,), jnp.float32) * 0.1
    b_hh = jax.random.normal(k_bhh, (4 * H,), jnp.float32) * 0.1

    out = program_encoder_forward(x, emb_table, w_ih, w_hh, b_ih, b_hh)
    out = jax.block_until_ready(out)

    ref = _reference_forward(x, emb_table, w_ih, w_hh, b_ih, b_hh)
    assert out.shape == (B, T, H), out.shape
    assert jnp.allclose(out, ref, atol=1e-5, rtol=1e-5), "mismatch vs reference"

    print("KERNEL_OK")
</pallas_src>

<mosaic_0001>
module attributes {stable_mosaic.version = 11 : i64} {
  func.func @_lstm_kernel(%arg0: memref<16x1xi32, #tpu.memory_space<vmem>>, %arg1: memref<16x128xf32, #tpu.memory_space<vmem>>, %arg2: memref<32x128xf32, #tpu.memory_space<vmem>>, %arg3: memref<2x256xf32, #tpu.memory_space<vmem>>) attributes {dimension_semantics = [], scalar_prefetch = 0 : i64, scratch_operands = 0 : i64, tpu.core_type = #tpu.core_type<tc>} {
    %c0 = arith.constant 0 : index
    %c0_0 = arith.constant 0 : index
    %0 = vector.load %arg2[%c0, %c0_0] : memref<32x128xf32, #tpu.memory_space<vmem>>, vector<32x128xf32>
    %c0_1 = arith.constant 0 : index
    %c0_2 = arith.constant 0 : index
    %1 = vector.load %arg0[%c0_1, %c0_2] : memref<16x1xi32, #tpu.memory_space<vmem>>, vector<16x1xi32>
    %2 = tpu.iota {dimensions = array<i32: 1>} : vector<16x16xi32>
    %3 = vector.broadcast %1 : vector<16x1xi32> to vector<16x16xi32>
    %4 = arith.cmpi eq, %3, %2 : vector<16x16xi32>
    %5 = arith.extui %4 : vector<16x16xi1> to vector<16x16xi32>
    %6 = arith.sitofp %5 : vector<16x16xi32> to vector<16x16xf32>
    %c0_3 = arith.constant 0 : index
    %c0_4 = arith.constant 0 : index
    %7 = vector.load %arg1[%c0_3, %c0_4] : memref<16x128xf32, #tpu.memory_space<vmem>>, vector<16x128xf32>
    %cst = arith.constant dense<0.000000e+00> : vector<16x128xf32>
    %8 = tpu.matmul %6, %7, %cst {dimension_numbers = #tpu.dot_dimension_numbers<[1], [0], [0], [1], [0, 0, 1, 1], [], []>} : vector<16x16xf32>, vector<16x128xf32>, vector<16x128xf32> -> vector<16x128xf32>
    %cst_5 = arith.constant 0.000000e+00 : f32
    %9 = vector.broadcast %cst_5 : f32 to vector<2x32xf32>
    %cst_6 = arith.constant 0.000000e+00 : f32
    %10 = vector.broadcast %cst_6 : f32 to vector<2x32xf32>
    %11 = vector.extract_strided_slice %8 {offsets = [0, 0], sizes = [2, 128], strides = [1, 1]} : vector<16x128xf32> to vector<2x128xf32>
    %cst_7 = arith.constant dense<0.000000e+00> : vector<2x128xf32>
    %12 = tpu.matmul %9, %0, %cst_7 {dimension_numbers = #tpu.dot_dimension_numbers<[1], [0], [0], [1], [0, 0, 1, 1], [], []>} : vector<2x32xf32>, vector<32x128xf32>, vector<2x128xf32> -> vector<2x128xf32>
    %13 = arith.addf %11, %12 : vector<2x128xf32>
    %14 = arith.negf %13 : vector<2x128xf32>
    %15 = math.exp %14 : vector<2x128xf32>
    %cst_8 = arith.constant 1.000000e+00 : f32
    %16 = vector.broadcast %cst_8 : f32 to vector<2x128xf32>
    %17 = arith.addf %16, %15 : vector<2x128xf32>
    %18 = arith.divf %16, %17 : vector<2x128xf32>
    %19 = vector.extract_strided_slice %18 {offsets = [0, 0], sizes = [2, 32], strides = [1, 1]} : vector<2x128xf32> to vector<2x32xf32>
    %20 = vector.extract_strided_slice %18 {offsets = [0, 32], sizes = [2, 32], strides = [1, 1]} : vector<2x128xf32> to vector<2x32xf32>
    %21 = vector.extract_strided_slice %18 {offsets = [0, 64], sizes = [2, 32], strides = [1, 1]} : vector<2x128xf32> to vector<2x32xf32>
    %cst_9 = arith.constant 2.000000e+00 : f32
    %22 = vector.broadcast %cst_9 : f32 to vector<2x32xf32>
    %23 = arith.mulf %22, %21 : vector<2x32xf32>
    %cst_10 = arith.constant 1.000000e+00 : f32
    %24 = vector.broadcast %cst_10 : f32 to vector<2x32xf32>
    %25 = arith.subf %23, %24 : vector<2x32xf32>
    %26 = vector.extract_strided_slice %18 {offsets = [0, 96], sizes = [2, 32], strides = [1, 1]} : vector<2x128xf32> to vector<2x32xf32>
    %27 = arith.mulf %20, %10 : vector<2x32xf32>
    %28 = arith.mulf %19, %25 : vector<2x32xf32>
    %29 = arith.addf %27, %28 : vector<2x32xf32>
    %30 = math.tanh %29 : vector<2x32xf32>
    %31 = arith.mulf %26, %30 : vector<2x32xf32>
    %32 = vector.extract_strided_slice %8 {offsets = [2, 0], sizes = [2, 128], strides = [1, 1]} : vector<16x128xf32> to vector<2x128xf32>
    %cst_11 = arith.constant dense<0.000000e+00> : vector<2x128xf32>
    %33 = tpu.matmul %31, %0, %cst_11 {dimension_numbers = #tpu.dot_dimension_numbers<[1], [0], [0], [1], [0, 0, 1, 1], [], []>} : vector<2x32xf32>, vector<32x128xf32>, vector<2x128xf32> -> vector<2x128xf32>
    %34 = arith.addf %32, %33 : vector<2x128xf32>
    %35 = arith.negf %34 : vector<2x128xf32>
    %36 = math.exp %35 : vector<2x128xf32>
    %cst_12 = arith.constant 1.000000e+00 : f32
    %37 = vector.broadcast %cst_12 : f32 to vector<2x128xf32>
    %38 = arith.addf %37, %36 : vector<2x128xf32>
    %39 = arith.divf %37, %38 : vector<2x128xf32>
    %40 = vector.extract_strided_slice %39 {offsets = [0, 0], sizes = [2, 32], strides = [1, 1]} : vector<2x128xf32> to vector<2x32xf32>
    %41 = vector.extract_strided_slice %39 {offsets = [0, 32], sizes = [2, 32], strides = [1, 1]} : vector<2x128xf32> to vector<2x32xf32>
    %42 = vector.extract_strided_slice %39 {offsets = [0, 64], sizes = [2, 32], strides = [1, 1]} : vector<2x128xf32> to vector<2x32xf32>
    %cst_13 = arith.constant 2.000000e+00 : f32
    %43 = vector.broadcast %cst_13 : f32 to vector<2x32xf32>
    %44 = arith.mulf %43, %42 : vector<2x32xf32>
    %cst_14 = arith.constant 1.000000e+00 : f32
    %45 = vector.broadcast %cst_14 : f32 to vector<2x32xf32>
    %46 = arith.subf %44, %45 : vector<2x32xf32>
    %47 = vector.extract_strided_slice %39 {offsets = [0, 96], sizes = [2, 32], strides = [1, 1]} : vector<2x128xf32> to vector<2x32xf32>
    %48 = arith.mulf %41, %29 : vector<2x32xf32>
    %49 = arith.mulf %40, %46 : vector<2x32xf32>
    %50 = arith.addf %48, %49 : vector<2x32xf32>
    %51 = math.tanh %50 : vector<2x32xf32>
    %52 = arith.mulf %47, %51 : vector<2x32xf32>
    %53 = vector.extract_strided_slice %8 {offsets = [4, 0], sizes = [2, 128], strides = [1, 1]} : vector<16x128xf32> to vector<2x128xf32>
    %cst_15 = arith.constant dense<0.000000e+00> : vector<2x128xf32>
    %54 = tpu.matmul %52, %0, %cst_15 {dimension_numbers = #tpu.dot_dimension_numbers<[1], [0], [0], [1], [0, 0, 1, 1], [], []>} : vector<2x32xf32>, vector<32x128xf32>, vector<2x128xf32> -> vector<2x128xf32>
    %55 = arith.addf %53, %54 : vector<2x128xf32>
    %56 = arith.negf %55 : vector<2x128xf32>
    %57 = math.exp %56 : vector<2x128xf32>
    %cst_16 = arith.constant 1.000000e+00 : f32
    %58 = vector.broadcast %cst_16 : f32 to vector<2x128xf32>
    %59 = arith.addf %58, %57 : vector<2x128xf32>
    %60 = arith.divf %58, %59 : vector<2x128xf32>
    %61 = vector.extract_strided_slice %60 {offsets = [0, 0], sizes = [2, 32], strides = [1, 1]} : vector<2x128xf32> to vector<2x32xf32>
    %62 = vector.extract_strided_slice %60 {offsets = [0, 32], sizes = [2, 32], strides = [1, 1]} : vector<2x128xf32> to vector<2x32xf32>
    %63 = vector.extract_strided_slice %60 {offsets = [0, 64], sizes = [2, 32], strides = [1, 1]} : vector<2x128xf32> to vector<2x32xf32>
    %cst_17 = arith.constant 2.000000e+00 : f32
    %64 = vector.broadcast %cst_17 : f32 to vector<2x32xf32>
    %65 = arith.mulf %64, %63 : vector<2x32xf32>
    %cst_18 = arith.constant 1.000000e+00 : f32
    %66 = vector.broadcast %cst_18 : f32 to vector<2x32xf32>
    %67 = arith.subf %65, %66 : vector<2x32xf32>
    %68 = vector.extract_strided_slice %60 {offsets = [0, 96], sizes = [2, 32], strides = [1, 1]} : vector<2x128xf32> to vector<2x32xf32>
    %69 = arith.mulf %62, %50 : vector<2x32xf32>
    %70 = arith.mulf %61, %67 : vector<2x32xf32>
    %71 = arith.addf %69, %70 : vector<2x32xf32>
    %72 = math.tanh %71 : vector<2x32xf32>
    %73 = arith.mulf %68, %72 : vector<2x32xf32>
    %74 = vector.extract_strided_slice %8 {offsets = [6, 0], sizes = [2, 128], strides = [1, 1]} : vector<16x128xf32> to vector<2x128xf32>
    %cst_19 = arith.constant dense<0.000000e+00> : vector<2x128xf32>
    %75 = tpu.matmul %73, %0, %cst_19 {dimension_numbers = #tpu.dot_dimension_numbers<[1], [0], [0], [1], [0, 0, 1, 1], [], []>} : vector<2x32xf32>, vector<32x128xf32>, vector<2x128xf32> -> vector<2x128xf32>
    %76 = arith.addf %74, %75 : vector<2x128xf32>
    %77 = arith.negf %76 : vector<2x128xf32>
    %78 = math.exp %77 : vector<2x128xf32>
    %cst_20 = arith.constant 1.000000e+00 : f32
    %79 = vector.broadcast %cst_20 : f32 to vector<2x128xf32>
    %80 = arith.addf %79, %78 : vector<2x128xf32>
    %81 = arith.divf %79, %80 : vector<2x128xf32>
    %82 = vector.extract_strided_slice %81 {offsets = [0, 0], sizes = [2, 32], strides = [1, 1]} : vector<2x128xf32> to vector<2x32xf32>
    %83 = vector.extract_strided_slice %81 {offsets = [0, 32], sizes = [2, 32], strides = [1, 1]} : vector<2x128xf32> to vector<2x32xf32>
    %84 = vector.extract_strided_slice %81 {offsets = [0, 64], sizes = [2, 32], strides = [1, 1]} : vector<2x128xf32> to vector<2x32xf32>
    %cst_21 = arith.constant 2.000000e+00 : f32
    %85 = vector.broadcast %cst_21 : f32 to vector<2x32xf32>
    %86 = arith.mulf %85, %84 : vector<2x32xf32>
    %cst_22 = arith.constant 1.000000e+00 : f32
    %87 = vector.broadcast %cst_22 : f32 to vector<2x32xf32>
    %88 = arith.subf %86, %87 : vector<2x32xf32>
    %89 = vector.extract_strided_slice %81 {offsets = [0, 96], sizes = [2, 32], strides = [1, 1]} : vector<2x128xf32> to vector<2x32xf32>
    %90 = arith.mulf %83, %71 : vector<2x32xf32>
    %91 = arith.mulf %82, %88 : vector<2x32xf32>
    %92 = arith.addf %90, %91 : vector<2x32xf32>
    %93 = math.tanh %92 : vector<2x32xf32>
    %94 = arith.mulf %89, %93 : vector<2x32xf32>
    %95 = vector.extract_strided_slice %8 {offsets = [8, 0], sizes = [2, 128], strides = [1, 1]} : vector<16x128xf32> to vector<2x128xf32>
    %cst_23 = arith.constant dense<0.000000e+00> : vector<2x128xf32>
    %96 = tpu.matmul %94, %0, %cst_23 {dimension_numbers = #tpu.dot_dimension_numbers<[1], [0], [0], [1], [0, 0, 1, 1], [], []>} : vector<2x32xf32>, vector<32x128xf32>, vector<2x128xf32> -> vector<2x128xf32>
    %97 = arith.addf %95, %96 : vector<2x128xf32>
    %98 = arith.negf %97 : vector<2x128xf32>
    %99 = math.exp %98 : vector<2x128xf32>
    %cst_24 = arith.constant 1.000000e+00 : f32
    %100 = vector.broadcast %cst_24 : f32 to vector<2x128xf32>
    %101 = arith.addf %100, %99 : vector<2x128xf32>
    %102 = arith.divf %100, %101 : vector<2x128xf32>
    %103 = vector.extract_strided_slice %102 {offsets = [0, 0], sizes = [2, 32], strides = [1, 1]} : vector<2x128xf32> to vector<2x32xf32>
    %104 = vector.extract_strided_slice %102 {offsets = [0, 32], sizes = [2, 32], strides = [1, 1]} : vector<2x128xf32> to vector<2x32xf32>
    %105 = vector.extract_strided_slice %102 {offsets = [0, 64], sizes = [2, 32], strides = [1, 1]} : vector<2x128xf32> to vector<2x32xf32>
    %cst_25 = arith.constant 2.000000e+00 : f32
    %106 = vector.broadcast %cst_25 : f32 to vector<2x32xf32>
    %107 = arith.mulf %106, %105 : vector<2x32xf32>
    %cst_26 = arith.constant 1.000000e+00 : f32
    %108 = vector.broadcast %cst_26 : f32 to vector<2x32xf32>
    %109 = arith.subf %107, %108 : vector<2x32xf32>
    %110 = vector.extract_strided_slice %102 {offsets = [0, 96], sizes = [2, 32], strides = [1, 1]} : vector<2x128xf32> to vector<2x32xf32>
    %111 = arith.mulf %104, %92 : vector<2x32xf32>
    %112 = arith.mulf %103, %109 : vector<2x32xf32>
    %113 = arith.addf %111, %112 : vector<2x32xf32>
    %114 = math.tanh %113 : vector<2x32xf32>
    %115 = arith.mulf %110, %114 : vector<2x32xf32>
    %116 = vector.extract_strided_slice %8 {offsets = [10, 0], sizes = [2, 128], strides = [1, 1]} : vector<16x128xf32> to vector<2x128xf32>
    %cst_27 = arith.constant dense<0.000000e+00> : vector<2x128xf32>
    %117 = tpu.matmul %115, %0, %cst_27 {dimension_numbers = #tpu.dot_dimension_numbers<[1], [0], [0], [1], [0, 0, 1, 1], [], []>} : vector<2x32xf32>, vector<32x128xf32>, vector<2x128xf32> -> vector<2x128xf32>
    %118 = arith.addf %116, %117 : vector<2x128xf32>
    %119 = arith.negf %118 : vector<2x128xf32>
    %120 = math.exp %119 : vector<2x128xf32>
    %cst_28 = arith.constant 1.000000e+00 : f32
    %121 = vector.broadcast %cst_28 : f32 to vector<2x128xf32>
    %122 = arith.addf %121, %120 : vector<2x128xf32>
    %123 = arith.divf %121, %122 : vector<2x128xf32>
    %124 = vector.extract_strided_slice %123 {offsets = [0, 0], sizes = [2, 32], strides = [1, 1]} : vector<2x128xf32> to vector<2x32xf32>
    %125 = vector.extract_strided_slice %123 {offsets = [0, 32], sizes = [2, 32], strides = [1, 1]} : vector<2x128xf32> to vector<2x32xf32>
    %126 = vector.extract_strided_slice %123 {offsets = [0, 64], sizes = [2, 32], strides = [1, 1]} : vector<2x128xf32> to vector<2x32xf32>
    %cst_29 = arith.constant 2.000000e+00 : f32
    %127 = vector.broadcast %cst_29 : f32 to vector<2x32xf32>
    %128 = arith.mulf %127, %126 : vector<2x32xf32>
    %cst_30 = arith.constant 1.000000e+00 : f32
    %129 = vector.broadcast %cst_30 : f32 to vector<2x32xf32>
    %130 = arith.subf %128, %129 : vector<2x32xf32>
    %131 = vector.extract_strided_slice %123 {offsets = [0, 96], sizes = [2, 32], strides = [1, 1]} : vector<2x128xf32> to vector<2x32xf32>
    %132 = arith.mulf %125, %113 : vector<2x32xf32>
    %133 = arith.mulf %124, %130 : vector<2x32xf32>
    %134 = arith.addf %132, %133 : vector<2x32xf32>
    %135 = math.tanh %134 : vector<2x32xf32>
    %136 = arith.mulf %131, %135 : vector<2x32xf32>
    %137 = vector.extract_strided_slice %8 {offsets = [12, 0], sizes = [2, 128], strides = [1, 1]} : vector<16x128xf32> to vector<2x128xf32>
    %cst_31 = arith.constant dense<0.000000e+00> : vector<2x128xf32>
    %138 = tpu.matmul %136, %0, %cst_31 {dimension_numbers = #tpu.dot_dimension_numbers<[1], [0], [0], [1], [0, 0, 1, 1], [], []>} : vector<2x32xf32>, vector<32x128xf32>, vector<2x128xf32> -> vector<2x128xf32>
    %139 = arith.addf %137, %138 : vector<2x128xf32>
    %140 = arith.negf %139 : vector<2x128xf32>
    %141 = math.exp %140 : vector<2x128xf32>
    %cst_32 = arith.constant 1.000000e+00 : f32
    %142 = vector.broadcast %cst_32 : f32 to vector<2x128xf32>
    %143 = arith.addf %142, %141 : vector<2x128xf32>
    %144 = arith.divf %142, %143 : vector<2x128xf32>
    %145 = vector.extract_strided_slice %144 {offsets = [0, 0], sizes = [2, 32], strides = [1, 1]} : vector<2x128xf32> to vector<2x32xf32>
    %146 = vector.extract_strided_slice %144 {offsets = [0, 32], sizes = [2, 32], strides = [1, 1]} : vector<2x128xf32> to vector<2x32xf32>
    %147 = vector.extract_strided_slice %144 {offsets = [0, 64], sizes = [2, 32], strides = [1, 1]} : vector<2x128xf32> to vector<2x32xf32>
    %cst_33 = arith.constant 2.000000e+00 : f32
    %148 = vector.broadcast %cst_33 : f32 to vector<2x32xf32>
    %149 = arith.mulf %148, %147 : vector<2x32xf32>
    %cst_34 = arith.constant 1.000000e+00 : f32
    %150 = vector.broadcast %cst_34 : f32 to vector<2x32xf32>
    %151 = arith.subf %149, %150 : vector<2x32xf32>
    %152 = vector.extract_strided_slice %144 {offsets = [0, 96], sizes = [2, 32], strides = [1, 1]} : vector<2x128xf32> to vector<2x32xf32>
    %153 = arith.mulf %146, %134 : vector<2x32xf32>
    %154 = arith.mulf %145, %151 : vector<2x32xf32>
    %155 = arith.addf %153, %154 : vector<2x32xf32>
    %156 = math.tanh %155 : vector<2x32xf32>
    %157 = arith.mulf %152, %156 : vector<2x32xf32>
    %158 = vector.extract_strided_slice %8 {offsets = [14, 0], sizes = [2, 128], strides = [1, 1]} : vector<16x128xf32> to vector<2x128xf32>
    %cst_35 = arith.constant dense<0.000000e+00> : vector<2x128xf32>
    %159 = tpu.matmul %157, %0, %cst_35 {dimension_numbers = #tpu.dot_dimension_numbers<[1], [0], [0], [1], [0, 0, 1, 1], [], []>} : vector<2x32xf32>, vector<32x128xf32>, vector<2x128xf32> -> vector<2x128xf32>
    %160 = arith.addf %158, %159 : vector<2x128xf32>
    %161 = arith.negf %160 : vector<2x128xf32>
    %162 = math.exp %161 : vector<2x128xf32>
    %cst_36 = arith.constant 1.000000e+00 : f32
    %163 = vector.broadcast %cst_36 : f32 to vector<2x128xf32>
    %164 = arith.addf %163, %162 : vector<2x128xf32>
    %165 = arith.divf %163, %164 : vector<2x128xf32>
    %166 = vector.extract_strided_slice %165 {offsets = [0, 0], sizes = [2, 32], strides = [1, 1]} : vector<2x128xf32> to vector<2x32xf32>
    %167 = vector.extract_strided_slice %165 {offsets = [0, 32], sizes = [2, 32], strides = [1, 1]} : vector<2x128xf32> to vector<2x32xf32>
    %168 = vector.extract_strided_slice %165 {offsets = [0, 64], sizes = [2, 32], strides = [1, 1]} : vector<2x128xf32> to vector<2x32xf32>
    %cst_37 = arith.constant 2.000000e+00 : f32
    %169 = vector.broadcast %cst_37 : f32 to vector<2x32xf32>
    %170 = arith.mulf %169, %168 : vector<2x32xf32>
    %cst_38 = arith.constant 1.000000e+00 : f32
    %171 = vector.broadcast %cst_38 : f32 to vector<2x32xf32>
    %172 = arith.subf %170, %171 : vector<2x32xf32>
    %173 = vector.extract_strided_slice %165 {offsets = [0, 96], sizes = [2, 32], strides = [1, 1]} : vector<2x128xf32> to vector<2x32xf32>
    %174 = arith.mulf %167, %155 : vector<2x32xf32>
    %175 = arith.mulf %166, %172 : vector<2x32xf32>
    %176 = arith.addf %174, %175 : vector<2x32xf32>
    %177 = math.tanh %176 : vector<2x32xf32>
    %178 = arith.mulf %173, %177 : vector<2x32xf32>
    %179 = tpu.concatenate %31, %52, %73, %94, %115, %136, %157, %178 in 1 : vector<2x32xf32>, vector<2x32xf32>, vector<2x32xf32>, vector<2x32xf32>, vector<2x32xf32>, vector<2x32xf32>, vector<2x32xf32>, vector<2x32xf32> -> vector<2x256xf32>
    %c0_39 = arith.constant 0 : index
    %c0_40 = arith.constant 0 : index
    %180 = vector.load %arg3[%c0_39, %c0_40] : memref<2x256xf32, #tpu.memory_space<vmem>>, vector<2x256xf32>
    tpu.vector_store %arg3[%c0_39, %c0_40], %179 {strides = array<i32>} : memref<2x256xf32, #tpu.memory_space<vmem>>, vector<2x256xf32>,
    return
  }
}

</mosaic_0001>

<bundles_post_ra>
// kernel: program_encoder_forward.1
= control target key start
LH: loop header
LB: loop body
LE: loop exit
PB: predicated region body
PF: predicated region fallthrough
CT: control target
= control target key end

     0   :  { %v1286_v0 = vmov 0   ;;  %v1287_v2 = vmov 0.0|0.0   ;;  %vm1288_vm0 = vmmov 0   ;;  %v1289_v13 = vmov 0.0   ;;  %s1478_s0 = inlined_call_operand.vmem [shape: s32[16,1], index: 0, kind: input, shape index: {}]   ;;  %s1479_s2 = inlined_call_operand.vmem [shape: f32[32,128], index: 2, kind: input, shape index: {}]   ;;  %s1480_s1 = inlined_call_operand.vmem [shape: f32[16,128], index: 1, kind: input, shape index: {}]   ;;  %s1481_s3 = inlined_call_operand.vmem [shape: f32[2,256], index: 3, kind: output, shape index: {}]  }
   0x1   :  { %1237 = vset.pattern.permute.xlu0 %v1286_v0  ;;  %v18_v1 = vld [vmem:[%s1478_s0] sm:$0xff]  ;;  %1182 = vmatprep.subr.bf16.mxu1 %v1287_v2  ;;  %v15_v4 = vld [vmem:[%s1479_s2 + $0x8] sm:$0xff]  ;;  %v16_v10 = vld [vmem:[%s1479_s2 + $0x10] sm:$0xff]  ;;  %v20_v14 = vlaneseq  ;;  %vm36_vm1 = vcmask 130048   ;;  %vm118_vm4 = vcmask 261120   ;;  %vm988_vm5 = vcmask 523264  }
   0x2   :  { %v14_v3 = vld [vmem:[%s1479_s2] sm:$0xff]  ;;  %23 = vperm.xlu0 %1237, %v18_v1   ;;  %v35_v6 = vld [vmem:[%s1480_s1 + $0x8] sm:$0xff]  ;;  %v17_v11 = vld [vmem:[%s1479_s2 + $0x18] sm:$0xff]  ;;  %1098 = vmatprep.mubr.msk.f32.mxu1 %vm1288_vm0, %v1289_v13  ;;  %s1292_s2 = smov 96   ;;  %vm990_vm6 = vcmask 785408  }
   0x3   :  { %v34_v5 = vld [vmem:[%s1480_s1] sm:$0xff]  ;;  %v19_v7 = vld [vmem:[%s1478_s0 + $0x8] sm:$0xff]  ;;  %v1332_v8 = vpack.c.bf16 %v15_v4, %v14_v3  ;;  %v1341_v12 = vpack.c.bf16 %v17_v11, %v16_v10  ;;  %v21_v15 = vand.u32 127, %v20_v14  ;;  %s1290_s0 = smov 64   ;;  %s1291_s1 = smov 32  }
   0x4   :  { %v1178_v9 = vpack.c.bf16 %v35_v6, %v34_v5 }
   0x5   :  { %1184 = vmatpush3.bf16.msra.mxu1 %v1332_v8 }
   0x6   :  { %1179 = vmatprep.subr.bf16.mxu0 %v1178_v9  ;;  %26 = vperm.xlu0 %1237, %v19_v7  }
   0x7   :  { %1185 = vmatprep.subr.bf16.mxu1 %v1287_v2  ;;  %1181 = vmatpush3.bf16.msra.mxu0 %v1178_v9 }
   0x8   :  { %1188 = vmatprep.subr.bf16.mxu0 %v1287_v2 }
   0x9   :  { %1187 = vmatpush3.bf16.msra.mxu1 %v1341_v12 }
   0xa   :  { %1194 = vmatprep.subr.bf16.mxu1 %v1287_v2 }
   0xc   :  { %1099 = vmatmul.mubr.f32.vlgmr.msra.gmra.mrb[0].mxu1 %v1289_v13 }
   0xd   :  { %1196 = vmatpush3.bf16.msra.mxu1 %v1332_v8  ;;  %1120 = vmatprep.mubr.msk.f32.mxu1 %vm1288_vm0, %v1289_v13 }
   0xe   :  { %1197 = vmatprep.subr.bf16.mxu1 %v1287_v2 }
  0x11   :  { %1199 = vmatpush3.bf16.msra.mxu1 %v1341_v12 }
  0x12   :  { %1206 = vmatprep.subr.bf16.mxu1 %v1287_v2 }
  0x81   :  { %v24_v16 = vpop.permute.xlu0 %23 }
  0x82   :  { %vm28_vm2 = vcmp.eq.s32.totalorder %v24_v16, %v21_v15 }
  0x83   :  { %v1011_v17 = vsel %vm28_vm2, 1.0, %v1289_v13 }
  0x84   :  { %1087 = vmatprep.mubr.msk.f32.mxu0 %vm36_vm1, %v1011_v17 }
  0x85   :  { %v27_v18 = vpop.permute.xlu0 %26 }
  0x86   :  { %vm29_vm3 = vcmp.eq.s32.totalorder %v27_v18, %v21_v15 }
  0x87   :  { %v1012_v19 = vsel %vm29_vm3, 1.0, %v1289_v13 }
  0x88   :  { %1088 = vmatmul.mubr.msk.f32.vlgmr.msra.gmra.mrb[0].mxu0 %vm36_vm1, %v1012_v19 }
  0x89   :  { %1190 = vmatpush3.bf16.msra.mxu0 %v1332_v8  ;;  %1109 = vmatprep.mubr.msk.f32.mxu0 %vm1288_vm0, %v1289_v13 }
  0x8a   :  { %1191 = vmatprep.subr.bf16.mxu0 %v1287_v2 }
  0x8d   :  { %1193 = vmatpush3.bf16.msra.mxu0 %v1341_v12 }
  0x8e   :  { %1200 = vmatprep.subr.bf16.mxu0 %v1287_v2 }
  0xdf   :  { %v188_v20 = vpop.f32.mrb[0].mxu1 }
  0xe0   :  { %v1100_v21 = vpop.f32.mrb[1].mxu1 }
 0x15b   :  { %v1364_v22 = vpop.f32.mrb[0].mxu0 }
 0x15c   :  { %v1366_v23 = vpop.f32.mrb[1].mxu0 }
 0x15d   :  { %v192_v24 = vadd.f32 %v188_v20, %v1366_v23 }
 0x15f   :  { %v1015_v25 = vmul.f32 -1.442695, %v192_v24 }
 0x161   :  { %1238 = vpow2.f32 %v1015_v25 }
 0x16b   :  { %v1239_v26 = vpop.eup %1238 }
 0x16c   :  { %v196_v27 = vadd.f32 1.0, %v1239_v26 }
 0x16e   :  { %1240 = vrcp.f32 %v196_v27 }
 0x178   :  { %v1241_v28 = vpop.eup %1240 }
 0x179   :  { %v199_v29 = vmul.f32 2.0, %v1241_v28  ;;  %v201_v33 = vmul.f32 0.0, %v1241_v28 }
 0x17b   :  { %v1016_v30 = vadd.f32 -1.0, %v199_v29 }
 0x17d   :  { %203 = vrot.lane.b32.xlu1 %v1016_v30, %s1290_s0 }
 0x1ef   :  { %v204_v31 = vpop.permute.xlu1 %203 }
 0x1f0   :  { %v206_v32 = vmul.f32 %v1241_v28, %v204_v31 }
 0x1f2   :  { %208 = vrot.lane.b32.xlu1 %v206_v32, %s1291_s1 }
 0x264   :  { %v209_v34 = vpop.permute.xlu1 %208 }
 0x265   :  { %v211_v35 = vadd.f32 %v209_v34, %v201_v33 }
 0x267   :  { %1242 = vtanh.f32 %v211_v35  ;;  %v306_v52 = vrot.slane %v211_v35, 6 }
 0x271   :  { %v1243_v36 = vpop.eup %1242 }
 0x272   :  { %214 = vrot.lane.b32.xlu0 %v1243_v36, %s1290_s0 }
 0x2e4   :  { %v215_v37 = vpop.permute.xlu0 %214 }
 0x2e5   :  { %v217_v38 = vmul.f32 %v1241_v28, %v215_v37 }
 0x2e7   :  { %219 = vrot.lane.b32.xlu1 %v217_v38, %s1291_s1 }
 0x359   :  { %v1373_v39 = vpop.permute.xlu1 %219 }
 0x35a   :  { %1110 = vmatmul.mubr.msk.f32.vlgmr.msra.gmra.mrb[2].mxu0 %vm118_vm4, %v1373_v39 }
 0x35b   :  { %1202 = vmatpush3.bf16.msra.mxu0 %v1332_v8  ;;  %1131 = vmatprep.mubr.msk.f32.mxu0 %vm1288_vm0, %v1289_v13 }
 0x35c   :  { %1203 = vmatprep.subr.bf16.mxu0 %v1287_v2 }
 0x35f   :  { %1205 = vmatpush3.bf16.msra.mxu0 %v1341_v12 }
 0x360   :  { %1212 = vmatprep.subr.bf16.mxu0 %v1287_v2 }
 0x42d   :  { %v289_v40 = vpop.f32.mrb[2].mxu0 }
 0x42e   :  { %v294_v41 = vrot.slane %v289_v40, 6  ;;  %v1111_v42 = vpop.f32.mrb[3].mxu0 }
 0x430   :  { %v296_v43 = vadd.f32 %v294_v41, %v1366_v23 }
 0x432   :  { %v1018_v44 = vmul.f32 -1.442695, %v296_v43 }
 0x434   :  { %1244 = vpow2.f32 %v1018_v44 }
 0x43e   :  { %v1245_v45 = vpop.eup %1244 }
 0x43f   :  { %v300_v46 = vadd.f32 1.0, %v1245_v45 }
 0x441   :  { %1246 = vrcp.f32 %v300_v46 }
 0x44b   :  { %v1247_v47 = vpop.eup %1246 }
 0x44c   :  { %v303_v48 = vmul.f32 2.0, %v1247_v47  ;;  %v308_v53 = vmul.f32 %v1247_v47, %v306_v52 }
 0x44e   :  { %v1019_v49 = vadd.f32 -1.0, %v303_v48 }
 0x450   :  { %310 = vrot.lane.b32.xlu0 %v1019_v49, %s1290_s0 }
 0x4c2   :  { %v311_v50 = vpop.permute.xlu0 %310 }
 0x4c3   :  { %v313_v51 = vmul.f32 %v1247_v47, %v311_v50 }
 0x4c5   :  { %315 = vrot.lane.b32.xlu1 %v313_v51, %s1291_s1 }
 0x537   :  { %v316_v54 = vpop.permute.xlu1 %315 }
 0x538   :  { %v318_v55 = vadd.f32 %v316_v54, %v308_v53 }
 0x53a   :  { %1248 = vtanh.f32 %v318_v55  ;;  %v414_v11 = vrot.slane %v318_v55, 6 }
 0x544   :  { %v1249_v56 = vpop.eup %1248 }
 0x545   :  { %321 = vrot.lane.b32.xlu0 %v1249_v56, %s1290_s0 }
 0x5b7   :  { %v322_v57 = vpop.permute.xlu0 %321 }
 0x5b8   :  { %v1387_v58 = vmul.f32 %v1247_v47, %v322_v57 }
 0x5ba   :  { %v326_v59 = vrot.slane %v1387_v58, 2 }
 0x5bc   :  { %327 = vrot.lane.b32.xlu1 %v326_v59, %s1291_s1 }
 0x62e   :  { %v328_v60 = vpop.permute.xlu1 %327 }
 0x62f   :  { %1121 = vmatmul.mubr.msk.f32.vlgmr.msra.gmra.mrb[2].mxu1 %vm118_vm4, %v328_v60 }
 0x630   :  { %1208 = vmatpush3.bf16.msra.mxu1 %v1332_v8  ;;  %1142 = vmatprep.mubr.msk.f32.mxu1 %vm1288_vm0, %v1289_v13 }
 0x631   :  { %1209 = vmatprep.subr.bf16.mxu1 %v1287_v2 }
 0x634   :  { %1211 = vmatpush3.bf16.msra.mxu1 %v1341_v12 }
 0x635   :  { %1218 = vmatprep.subr.bf16.mxu1 %v1287_v2 }
 0x702   :  { %v397_v61 = vpop.f32.mrb[2].mxu1 }
 0x703   :  { %v402_v62 = vrot.slane %v397_v61, 4  ;;  %v1122_v63 = vpop.f32.mrb[3].mxu1 }
 0x705   :  { %v404_v0 = vadd.f32 %v402_v62, %v1366_v23 }
 0x707   :  { %v1021_v1 = vmul.f32 -1.442695, %v404_v0 }
 0x709   :  { %1250 = vpow2.f32 %v1021_v1 }
 0x713   :  { %v1251_v3 = vpop.eup %1250 }
 0x714   :  { %v408_v4 = vadd.f32 1.0, %v1251_v3 }
 0x716   :  { %1252 = vrcp.f32 %v408_v4 }
 0x720   :  { %v1253_v5 = vpop.eup %1252 }
 0x721   :  { %v411_v6 = vmul.f32 2.0, %v1253_v5  ;;  %v416_v14 = vmul.f32 %v1253_v5, %v414_v11 }
 0x723   :  { %v1022_v7 = vadd.f32 -1.0, %v411_v6 }
 0x725   :  { %418 = vrot.lane.b32.xlu0 %v1022_v7, %s1290_s0 }
 0x797   :  { %v419_v9 = vpop.permute.xlu0 %418 }
 0x798   :  { %v421_v10 = vmul.f32 %v1253_v5, %v419_v9 }
 0x79a   :  { %423 = vrot.lane.b32.xlu1 %v421_v10, %s1291_s1 }
 0x80c   :  { %v424_v15 = vpop.permute.xlu1 %423 }
 0x80d   :  { %v426_v16 = vadd.f32 %v424_v15, %v416_v14 }
 0x80f   :  { %1254 = vtanh.f32 %v426_v16  ;;  %v522_v36 = vrot.slane %v426_v16, 6 }
 0x819   :  { %v1255_v17 = vpop.eup %1254 }
 0x81a   :  { %429 = vrot.lane.b32.xlu0 %v1255_v17, %s1290_s0 }
 0x88c   :  { %v430_v18 = vpop.permute.xlu0 %429 }
 0x88d   :  { %v1404_v19 = vmul.f32 %v1253_v5, %v430_v18 }
 0x88f   :  { %v434_v20 = vrot.slane %v1404_v19, 4 }
 0x891   :  { %435 = vrot.lane.b32.xlu1 %v434_v20, %s1291_s1 }
 0x903   :  { %v436_v21 = vpop.permute.xlu1 %435 }
 0x904   :  { %1132 = vmatmul.mubr.msk.f32.vlgmr.msra.gmra.mrb[4].mxu0 %vm118_vm4, %v436_v21 }
 0x905   :  { %1214 = vmatpush3.bf16.msra.mxu0 %v1332_v8  ;;  %1153 = vmatprep.mubr.msk.f32.mxu0 %vm1288_vm0, %v1289_v13 }
 0x906   :  { %1215 = vmatprep.subr.bf16.mxu0 %v1287_v2 }
 0x909   :  { %1217 = vmatpush3.bf16.msra.mxu0 %v1341_v12 }
 0x90a   :  { %1224 = vmatprep.subr.bf16.mxu0 %v1287_v2 }
 0x9d7   :  { %v505_v24 = vpop.f32.mrb[4].mxu0 }
 0x9d8   :  { %v510_v25 = vrot.slane %v505_v24, 2  ;;  %v1133_v26 = vpop.f32.mrb[5].mxu0 }
 0x9da   :  { %v512_v27 = vadd.f32 %v510_v25, %v1366_v23 }
 0x9dc   :  { %v1024_v28 = vmul.f32 -1.442695, %v512_v27 }
 0x9de   :  { %1256 = vpow2.f32 %v1024_v28 }
 0x9e8   :  { %v1257_v29 = vpop.eup %1256 }
 0x9e9   :  { %v516_v30 = vadd.f32 1.0, %v1257_v29 }
 0x9eb   :  { %1258 = vrcp.f32 %v516_v30 }
 0x9f5   :  { %v1259_v31 = vpop.eup %1258 }
 0x9f6   :  { %v519_v32 = vmul.f32 2.0, %v1259_v31  ;;  %v524_v37 = vmul.f32 %v1259_v31, %v522_v36 }
 0x9f8   :  { %v1025_v33 = vadd.f32 -1.0, %v519_v32 }
 0x9fa   :  { %526 = vrot.lane.b32.xlu0 %v1025_v33, %s1290_s0 }
 0xa6c   :  { %v527_v34 = vpop.permute.xlu0 %526 }
 0xa6d   :  { %v529_v35 = vmul.f32 %v1259_v31, %v527_v34 }
 0xa6f   :  { %531 = vrot.lane.b32.xlu1 %v529_v35, %s1291_s1 }
 0xae1   :  { %v532_v38 = vpop.permute.xlu1 %531 }
 0xae2   :  { %v534_v40 = vadd.f32 %v532_v38, %v524_v37 }
 0xae4   :  { %1260 = vtanh.f32 %v534_v40  ;;  %v627_v56 = vrot.slane %v534_v40, 6 }
 0xaee   :  { %v1261_v23 = vpop.eup %1260 }
 0xaef   :  { %537 = vrot.lane.b32.xlu0 %v1261_v23, %s1290_s0 }
 0xb61   :  { %v538_v41 = vpop.permute.xlu0 %537 }
 0xb62   :  { %v1421_v42 = vmul.f32 %v1259_v31, %v538_v41 }
 0xb64   :  { %v542_v43 = vrot.slane %v1421_v42, 6 }
 0xb66   :  { %543 = vrot.lane.b32.xlu1 %v542_v43, %s1291_s1 }
 0xbd8   :  { %v544_v44 = vpop.permute.xlu1 %543 }
 0xbd9   :  { %1143 = vmatmul.mubr.msk.f32.vlgmr.msra.gmra.mrb[4].mxu1 %vm118_vm4, %v544_v44 }
 0xbda   :  { %1220 = vmatpush3.bf16.msra.mxu1 %v1332_v8  ;;  %1164 = vmatprep.mubr.msk.f32.mxu1 %vm1288_vm0, %v1289_v13 }
 0xbdb   :  { %1221 = vmatprep.subr.bf16.mxu1 %v1287_v2 }
 0xbde   :  { %1223 = vmatpush3.bf16.msra.mxu1 %v1341_v12 }
 0xcac   :  { %v613_v45 = vpop.f32.mrb[4].mxu1 }
 0xcad   :  { %v617_v46 = vadd.f32 %v1364_v22, %v613_v45  ;;  %v1144_v47 = vpop.f32.mrb[5].mxu1 }
 0xcaf   :  { %v1027_v48 = vmul.f32 -1.442695, %v617_v46 }
 0xcb1   :  { %1262 = vpow2.f32 %v1027_v48 }
 0xcbb   :  { %v1263_v49 = vpop.eup %1262 }
 0xcbc   :  { %v621_v50 = vadd.f32 1.0, %v1263_v49 }
 0xcbe   :  { %1264 = vrcp.f32 %v621_v50 }
 0xcc8   :  { %v1265_v51 = vpop.eup %1264 }
 0xcc9   :  { %v624_v52 = vmul.f32 2.0, %v1265_v51  ;;  %v629_v57 = vmul.f32 %v1265_v51, %v627_v56 }
 0xccb   :  { %v1028_v53 = vadd.f32 -1.0, %v624_v52 }
 0xccd   :  { %631 = vrot.lane.b32.xlu0 %v1028_v53, %s1290_s0 }
 0xd3f   :  { %v632_v54 = vpop.permute.xlu0 %631 }
 0xd40   :  { %v634_v55 = vmul.f32 %v1265_v51, %v632_v54 }
 0xd42   :  { %636 = vrot.lane.b32.xlu1 %v634_v55, %s1291_s1 }
 0xdb4   :  { %v637_v60 = vpop.permute.xlu1 %636 }
 0xdb5   :  { %v639_v61 = vadd.f32 %v637_v60, %v629_v57 }
 0xdb7   :  { %1266 = vtanh.f32 %v639_v61 }
 0xdc1   :  { %v1267_v62 = vpop.eup %1266 }
 0xdc2   :  { %642 = vrot.lane.b32.xlu0 %v1267_v62, %s1290_s0 }
 0xe34   :  { %v643_v63 = vpop.permute.xlu0 %642 }
 0xe35   :  { %v645_v0 = vmul.f32 %v1265_v51, %v643_v63 }
 0xe37   :  { %647 = vrot.lane.b32.xlu1 %v645_v0, %s1291_s1 }
 0xea9   :  { %v1438_v1 = vpop.permute.xlu1 %647 }
 0xeaa   :  { %1154 = vmatmul.mubr.msk.f32.vlgmr.msra.gmra.mrb[6].mxu0 %vm118_vm4, %v1438_v1 }
 0xeab   :  { %1226 = vmatpush3.bf16.msra.mxu0 %v1332_v8  ;;  %1175 = vmatprep.mubr.msk.f32.mxu0 %vm1288_vm0, %v1289_v13 }
 0xeac   :  { %1227 = vmatprep.subr.bf16.mxu0 %v1287_v2  ;;  %v734_v2 = vrot.slane %v639_v61, 6 }
 0xeaf   :  { %1229 = vmatpush3.bf16.msra.mxu0 %v1341_v12 }
 0xf7d   :  { %v717_v3 = vpop.f32.mrb[6].mxu0 }
 0xf7e   :  { %v722_v4 = vrot.slane %v717_v3, 6  ;;  %v1155_v5 = vpop.f32.mrb[7].mxu0 }
 0xf80   :  { %v724_v6 = vadd.f32 %v1364_v22, %v722_v4 }
 0xf82   :  { %v1030_v7 = vmul.f32 -1.442695, %v724_v6 }
 0xf84   :  { %1268 = vpow2.f32 %v1030_v7 }
 0xf8e   :  { %v1269_v9 = vpop.eup %1268 }
 0xf8f   :  { %v728_v10 = vadd.f32 1.0, %v1269_v9 }
 0xf91   :  { %1270 = vrcp.f32 %v728_v10 }
 0xf9b   :  { %v1271_v11 = vpop.eup %1270 }
 0xf9c   :  { %v731_v14 = vmul.f32 2.0, %v1271_v11  ;;  %v736_v12 = vmul.f32 %v1271_v11, %v734_v2 }
 0xf9e   :  { %v1031_v8 = vadd.f32 -1.0, %v731_v14 }
 0xfa0   :  { %738 = vrot.lane.b32.xlu0 %v1031_v8, %s1290_s0 }
0x1012   :  { %v739_v13 = vpop.permute.xlu0 %738 }
0x1013   :  { %v741_v15 = vmul.f32 %v1271_v11, %v739_v13 }
0x1015   :  { %743 = vrot.lane.b32.xlu1 %v741_v15, %s1291_s1 }
0x1087   :  { %v744_v16 = vpop.permute.xlu1 %743 }
0x1088   :  { %v746_v17 = vadd.f32 %v744_v16, %v736_v12 }
0x108a   :  { %1272 = vtanh.f32 %v746_v17  ;;  %v842_v40 = vrot.slane %v746_v17, 6 }
0x1094   :  { %v1273_v18 = vpop.eup %1272 }
0x1095   :  { %749 = vrot.lane.b32.xlu0 %v1273_v18, %s1290_s0 }
0x1107   :  { %v750_v21 = vpop.permute.xlu0 %749 }
0x1108   :  { %v752_v24 = vmul.f32 %v1271_v11, %v750_v21 }
0x110a   :  { %v754_v25 = vrot.slane %v752_v24, 2 }
0x110c   :  { %755 = vrot.lane.b32.xlu1 %v754_v25, %s1291_s1 }
0x117e   :  { %v756_v26 = vpop.permute.xlu1 %755 }
0x117f   :  { %1165 = vmatmul.mubr.msk.f32.vlgmr.msra.gmra.mrb[6].mxu1 %vm118_vm4, %v756_v26 }
0x1252   :  { %v825_v27 = vpop.f32.mrb[6].mxu1 }
0x1253   :  { %v830_v28 = vrot.slane %v825_v27, 4  ;;  %v1166_v29 = vpop.f32.mrb[7].mxu1 }
0x1255   :  { %v832_v30 = vadd.f32 %v1364_v22, %v830_v28 }
0x1257   :  { %v1033_v31 = vmul.f32 -1.442695, %v832_v30 }
0x1259   :  { %1274 = vpow2.f32 %v1033_v31 }
0x1263   :  { %v1275_v32 = vpop.eup %1274 }
0x1264   :  { %v836_v33 = vadd.f32 1.0, %v1275_v32 }
0x1266   :  { %1276 = vrcp.f32 %v836_v33 }
0x1270   :  { %v1277_v34 = vpop.eup %1276 }
0x1271   :  { %v839_v35 = vmul.f32 2.0, %v1277_v34  ;;  %v844_v23 = vmul.f32 %v1277_v34, %v842_v40 }
0x1273   :  { %v1034_v36 = vadd.f32 -1.0, %v839_v35 }
0x1275   :  { %846 = vrot.lane.b32.xlu0 %v1034_v36, %s1290_s0 }
0x12e7   :  { %v847_v37 = vpop.permute.xlu0 %846 }
0x12e8   :  { %v849_v38 = vmul.f32 %v1277_v34, %v847_v37 }
0x12ea   :  { %851 = vrot.lane.b32.xlu1 %v849_v38, %s1291_s1 }
0x135c   :  { %v852_v41 = vpop.permute.xlu1 %851 }
0x135d   :  { %v854_v44 = vadd.f32 %v852_v41, %v844_v23 }
0x135f   :  { %1278 = vtanh.f32 %v854_v44 }
0x1369   :  { %v1279_v45 = vpop.eup %1278 }
0x136a   :  { %857 = vrot.lane.b32.xlu0 %v1279_v45, %s1290_s0 }
0x13dc   :  { %v858_v46 = vpop.permute.xlu0 %857 }
0x13dd   :  { %v860_v47 = vmul.f32 %v1277_v34, %v858_v46 }
0x13df   :  { %v862_v48 = vrot.slane %v860_v47, 4 }
0x13e1   :  { %863 = vrot.lane.b32.xlu1 %v862_v48, %s1291_s1 }
0x1453   :  { %v864_v49 = vpop.permute.xlu1 %863 }
0x1454   :  { %1176 = vmatmul.mubr.msk.f32.vlgmr.msra.gmra.mrb[8].mxu0 %vm118_vm4, %v864_v49 }
0x1527   :  { %v933_v50 = vpop.f32.mrb[8].mxu0 }
0x1528   :  { %v938_v51 = vrot.slane %v933_v50, 2  ;;  %v1177_v52 = vpop.f32.mrb[9].mxu0 }
0x152a   :  { %v940_v53 = vadd.f32 %v1364_v22, %v938_v51  ;;  %v950_v22 = vrot.slane %v854_v44, 6 }
0x152c   :  { %v1036_v54 = vmul.f32 -1.442695, %v940_v53 }
0x152e   :  { %1280 = vpow2.f32 %v1036_v54 }
0x1538   :  { %v1281_v55 = vpop.eup %1280 }
0x1539   :  { %v944_v56 = vadd.f32 1.0, %v1281_v55 }
0x153b   :  { %1282 = vrcp.f32 %v944_v56 }
0x1545   :  { %v1283_v57 = vpop.eup %1282 }
0x1546   :  { %v947_v60 = vmul.f32 2.0, %v1283_v57  ;;  %v952_v0 = vmul.f32 %v1283_v57, %v950_v22 }
0x1548   :  { %v1037_v61 = vadd.f32 -1.0, %v947_v60 }
0x154a   :  { %954 = vrot.lane.b32.xlu0 %v1037_v61, %s1290_s0 }
0x154e   :  { %978 = vrot.lane.b32.xlu0 %v754_v25, %s1290_s0 }
0x15bc   :  { %v955_v62 = vpop.permute.xlu0 %954 }
0x15bd   :  { %v957_v63 = vmul.f32 %v1283_v57, %v955_v62 }
0x15bf   :  { %959 = vrot.lane.b32.xlu1 %v957_v63, %s1291_s1 }
0x15c0   :  { %v979_v7 = vpop.permute.xlu0 %978 }
0x15c1   :  { %v992_v11 = vsel %vm118_vm4, %v1438_v1, %v979_v7 }
0x15c3   :  { %970 = vrot.lane.b32.xlu1 %v326_v59, %s1290_s0 }
0x15c7   :  { %973 = vrot.lane.b32.xlu1 %v434_v20, %s1292_s2 }
0x1631   :  { %v960_v3 = vpop.permute.xlu1 %959 }
0x1632   :  { %v962_v4 = vadd.f32 %v960_v3, %v952_v0 }
0x1634   :  { %1284 = vtanh.f32 %v962_v4 }
0x1635   :  { %v971_v6 = vpop.permute.xlu1 %970 }
0x1636   :  { %v987_v59 = vsel %vm118_vm4, %v1373_v39, %v971_v6 }
0x1639   :  { %v974_v9 = vpop.permute.xlu1 %973 }
0x163a   :  { %v989_v19 = vsel %vm988_vm5, %v987_v59, %v974_v9 }
0x163b   :  { %v991_v13 = vsel %vm990_vm6, %v989_v19, %v542_v43 }
0x163e   :  { %v1285_v5 = vpop.eup %1284 }
0x163f   :  { %965 = vrot.lane.b32.xlu0 %v1285_v5, %s1290_s0 }
0x1643   :  { %981 = vrot.lane.b32.xlu0 %v862_v48, %s1292_s2 }
0x16b1   :  { %v966_v10 = vpop.permute.xlu0 %965 }
0x16b2   :  { %v968_v58 = vmul.f32 %v1283_v57, %v966_v10 }
0x16b4   :  { %v985_v20 = vrot.slane %v968_v58, 6 }
0x16b5   :  { %v982_v14 = vpop.permute.xlu0 %981 }
0x16b6   :  { %v993_v8 = vsel %vm988_vm5, %v992_v11, %v982_v14 }
0x16b7   :  { %v994_v15 = vsel %vm990_vm6, %v993_v8, %v985_v20 }
0x16b8   :  { %v997_v2 = vcombine.low %v991_v13, %v994_v15 }
0x16ba   :  { %1038 = vst.sshfl [vmem:[%s1481_s3] sm:$0x33 pattern:$0x76325410] %v997_v2 }

</bundles_post_ra>
